<compile_context>
chip_gen: v7x
topology: tpu7x:2x2x1
jax: 0.10.0
libtpu: 0.0.40
codegen_flags: <defaults>
</compile_context>

<pallas_src>
import functools
import random

import numpy as np
import jax
import jax.numpy as jnp
from jax import lax
from jax.experimental import pallas as pl
from jax.experimental.pallas import tpu as pltpu


# ----------------------------------------------------------------------------
# Kernels (trace-time specialized on is_cutmix; H baked as a static int)
# ----------------------------------------------------------------------------
def _make_blend_kernel(H, is_cutmix):
    if is_cutmix:
        def kernel(idx_ref, box_ref, lam_ref, x_ref, xs_ref, o_ref):
            # x_ref / xs_ref / o_ref: (C, ts) blocks of the (B, C, W*H) tensor.
            _, ts = x_ref.shape
            col0 = pl.program_id(1) * ts
            col = col0 + lax.broadcasted_iota(jnp.int32, (1, ts), 1)
            w = col // H
            h = col - w * H
            in_box = ((w >= box_ref[0]) & (w < box_ref[2]) &
                      (h >= box_ref[1]) & (h < box_ref[3]))
            # PyTorch: data[:, :, bbx1:bbx2, bby1:bby2] = data[indices, ...]
            o_ref[...] = jnp.where(in_box, xs_ref[...], x_ref[...])
        return kernel

    def kernel(idx_ref, box_ref, lam_ref, x_ref, xs_ref, o_ref):
        lam = lam_ref[0]
        x = x_ref[...].astype(jnp.float32)
        xs = xs_ref[...].astype(jnp.float32)
        o_ref[...] = (x * lam + xs * (1.0 - lam)).astype(o_ref.dtype)
    return kernel


def _choose_spatial_tile(S, row_bytes, max_block_bytes=4 * 1024 * 1024):
    """Pick a lane-dense tile size along the flattened W*H axis."""
    if S * row_bytes <= max_block_bytes:
        return S  # full extent fits comfortably in a block
    max_ts = max(128, (max_block_bytes // max(row_bytes, 1)) // 128 * 128)
    for ts in range(max_ts, 0, -128):
        if S % ts == 0:
            return ts
    # TODO(synk): pad S to a 128-multiple when it has no 128-aligned divisor.
    return S


# ----------------------------------------------------------------------------
# Pallas wrapper (jitted; is_cutmix is a static/trace-time arg)
# ----------------------------------------------------------------------------
@functools.partial(jax.jit, static_argnames=("is_cutmix",))
def mixup_blend_pallas(data, indices, ibox, lam, *, is_cutmix):
    """Blend (mixup) or paste-box (cutmix) with the batch gather fused in."""
    B, C, W, H = data.shape
    S = W * H
    itemsize = jnp.dtype(data.dtype).itemsize
    ts = _choose_spatial_tile(S, C * itemsize)
    grid = (B, S // ts)

    x = data.reshape(B, C, S)  # lane-dense layout

    block = (None, C, ts)  # batch dim squeezed out of the kernel view
    x_spec = pl.BlockSpec(block, lambda b, s, idx: (b, 0, s))
    xs_spec = pl.BlockSpec(block, lambda b, s, idx: (idx[b], 0, s))  # fused gather
    out_spec = pl.BlockSpec(block, lambda b, s, idx: (b, 0, s))
    smem_spec = pl.BlockSpec(memory_space=pltpu.MemorySpace.SMEM)

    block_bytes = C * ts * itemsize
    # 3 tensors (x, xs, out) x 2 pipeline buffers, plus headroom; stay < 64 MiB.
    vmem_limit = int(min(56 * 1024 * 1024, max(32 * 1024 * 1024, 8 * block_bytes)))

    out = pl.pallas_call(
        _make_blend_kernel(H, is_cutmix),
        out_shape=jax.ShapeDtypeStruct((B, C, S), data.dtype),
        grid_spec=pltpu.PrefetchScalarGridSpec(
            num_scalar_prefetch=1,                 # permutation -> SMEM
            grid=grid,
            in_specs=[smem_spec, smem_spec, x_spec, xs_spec],
            out_specs=out_spec,
        ),
        compiler_params=pltpu.CompilerParams(
            dimension_semantics=("parallel", "parallel"),
            vmem_limit_bytes=vmem_limit,
        ),
    )(indices, ibox, lam, x, x)   # same array passed twice; xs uses gather map

    return out.reshape(B, C, W, H)


# ----------------------------------------------------------------------------
# Host-side glue (matches the PyTorch reference semantics)
# ----------------------------------------------------------------------------
def rand_bbox(size, lam, rng):
    W = size[2]
    H = size[3]
    cut_rat = np.sqrt(1.0 - lam)
    cut_w = int(W * cut_rat)
    cut_h = int(H * cut_rat)
    cx = int(rng.integers(W))
    cy = int(rng.integers(H))
    bbx1 = int(np.clip(cx - cut_w // 2, 0, W))
    bby1 = int(np.clip(cy - cut_h // 2, 0, H))
    bbx2 = int(np.clip(cx + cut_w // 2, 0, W))
    bby2 = int(np.clip(cy + cut_h // 2, 0, H))
    return (bbx1, bby1, bbx2, bby2)


def mixup(data, labels, alpha, cut_mix, rng):
    targets1 = labels[:, 0]
    targets2 = labels[:, 1]
    targets3 = labels[:, 2]

    indices = jnp.asarray(rng.permutation(data.shape[0]), dtype=jnp.int32)
    shuffled_targets1 = targets1[indices]
    shuffled_targets2 = targets2[indices]
    shuffled_targets3 = targets3[indices]

    lam = float(rng.beta(alpha, alpha))
    lam_arr = np.asarray([lam], dtype=np.float32)

    if cut_mix:
        bbx1, bby1, bbx2, bby2 = rand_bbox(data.shape, lam, rng)
        ibox = np.asarray([bbx1, bby1, bbx2, bby2], dtype=np.int32)
        out = mixup_blend_pallas(data, indices, ibox, lam_arr, is_cutmix=True)
        lam = 1.0 - (bbx2 - bbx1) * (bby2 - bby1) / (data.shape[-1] * data.shape[-2])
    else:
        ibox = np.zeros((4,), dtype=np.int32)
        out = mixup_blend_pallas(data, indices, ibox, lam_arr, is_cutmix=False)

    targets = [
        targets1,
        shuffled_targets1,
        targets2,
        shuffled_targets2,
        targets3,
        shuffled_targets3,
        lam,
    ]
    return out, targets


class MixupAugmenter:
    """JAX/Pallas equivalent of the PyTorch MixupAugmenter (no learnable params)."""

    def __init__(self, cutmix_alpha=1.0, mixup_alpha=1.0, cutmix_prob=0.5, seed=0):
        self.cutmix_alpha = cutmix_alpha
        self.mixup_alpha = mixup_alpha
        self.cutmix_prob = cutmix_prob
        self._py_rng = random.Random(seed)
        self._np_rng = np.random.default_rng(seed)

    def __call__(self, data, labels):
        do_cutmix = self._py_rng.random() <= self.cutmix_prob
        alpha = self.cutmix_alpha if do_cutmix else self.mixup_alpha
        data, targets = mixup(data, labels, alpha, do_cutmix, self._np_rng)
        return data, targets


# ----------------------------------------------------------------------------
# Self-test
# ----------------------------------------------------------------------------
if __name__ == "__main__":
    key = jax.random.PRNGKey(0)
    kd, kl = jax.random.split(key)

    B, C, W, H = 2, 4, 16, 16
    data = jax.random.normal(kd, (B, C, W, H), dtype=jnp.float32)
    labels = jax.random.randint(kl, (B, 3), 0, 10, dtype=jnp.int32)

    aug = MixupAugmenter(cutmix_alpha=1.0, mixup_alpha=1.0, cutmix_prob=0.5, seed=0)
    out, targets = aug(data, labels)
    out = jax.block_until_ready(out)
    assert out.shape == (B, C, W, H) and out.dtype == jnp.float32
    assert len(targets) == 7

    # --- verification against pure-JAX/numpy references for both branches ---
    rng = np.random.default_rng(123)
    indices = jnp.asarray(rng.permutation(B), dtype=jnp.int32)
    shuffled = np.asarray(data)[np.asarray(indices)]

    lam = 0.37
    lam_arr = np.asarray([lam], dtype=np.float32)
    zero_box = np.zeros((4,), dtype=np.int32)

    # mixup branch (fused gather inside the kernel)
    got_mix = jax.block_until_ready(
        mixup_blend_pallas(data, indices, zero_box, lam_arr, is_cutmix=False)
    )
    ref_mix = np.asarray(data) * lam + shuffled * (1.0 - lam)
    np.testing.assert_allclose(np.asarray(got_mix), ref_mix, rtol=1e-6, atol=1e-6)

    # cutmix branch
    bbox = (3, 5, 11, 13)
    ibox = np.asarray(bbox, dtype=np.int32)
    got_cut = jax.block_until_ready(
        mixup_blend_pallas(data, indices, ibox, lam_arr, is_cutmix=True)
    )
    ref_cut = np.asarray(data).copy()
    ref_cut[:, :, bbox[0]:bbox[2], bbox[1]:bbox[3]] = shuffled[
        :, :, bbox[0]:bbox[2], bbox[1]:bbox[3]
    ]
    np.testing.assert_allclose(np.asarray(got_cut), ref_cut, rtol=1e-6, atol=1e-6)

    # bf16 dtype path (explicit cast before store)
    data_bf16 = data.astype(jnp.bfloat16)
    got_bf16 = jax.block_until_ready(
        mixup_blend_pallas(data_bf16, indices, zero_box, lam_arr, is_cutmix=False)
    )
    ref_bf16 = (
        np.asarray(data_bf16).astype(np.float32) * lam
        + np.asarray(data_bf16)[np.asarray(indices)].astype(np.float32) * (1.0 - lam)
    )
    np.testing.assert_allclose(
        np.asarray(got_bf16).astype(np.float32), ref_bf16, rtol=2e-2, atol=2e-2
    )

    print("KERNEL_OK")
</pallas_src>

<mosaic_0001>
module attributes {stable_mosaic.version = 11 : i64} {
  func.func @kernel(%arg0: i32, %arg1: i32, %arg2: memref<2xi32, #tpu.memory_space<smem>>, %arg3: memref<4xi32, #tpu.memory_space<smem>>, %arg4: memref<1xf32, #tpu.memory_space<smem>>, %arg5: memref<1x4x256xf32, #tpu.memory_space<vmem>>, %arg6: memref<1x4x256xf32, #tpu.memory_space<vmem>>, %arg7: memref<1x4x256xf32, #tpu.memory_space<vmem>>) attributes {dimension_semantics = [#tpu.dimension_semantics<parallel>, #tpu.dimension_semantics<parallel>], iteration_bounds = array<i64: 2, 1>, scalar_prefetch = 1 : i64, scratch_operands = 0 : i64, tpu.core_type = #tpu.core_type<tc>, window_params = [{transform_indices = @transform_0, window_bounds = array<i64: 4>}, {transform_indices = @transform_1, window_bounds = array<i64: 1>}, {transform_indices = @transform_2, window_bounds = array<i64: 1, 4, 256>}, {transform_indices = @transform_3, window_bounds = array<i64: 1, 4, 256>}, {transform_indices = @transform_4, window_bounds = array<i64: 1, 4, 256>}]} {
    %c0 = arith.constant 0 : index
    %0 = memref.load %arg4[%c0] : memref<1xf32, #tpu.memory_space<smem>>
    %c0_0 = arith.constant 0 : index
    %c0_1 = arith.constant 0 : index
    %c0_2 = arith.constant 0 : index
    %1 = vector.load %arg5[%c0_0, %c0_1, %c0_2] : memref<1x4x256xf32, #tpu.memory_space<vmem>>, vector<1x4x256xf32>
    %2 = vector.shape_cast %1 : vector<1x4x256xf32> to vector<4x256xf32>
    %c0_3 = arith.constant 0 : index
    %c0_4 = arith.constant 0 : index
    %c0_5 = arith.constant 0 : index
    %3 = vector.load %arg6[%c0_3, %c0_4, %c0_5] : memref<1x4x256xf32, #tpu.memory_space<vmem>>, vector<1x4x256xf32>
    %4 = vector.shape_cast %3 : vector<1x4x256xf32> to vector<4x256xf32>
    %5 = vector.broadcast %0 : f32 to vector<4x256xf32>
    %6 = arith.mulf %2, %5 : vector<4x256xf32>
    %cst = arith.constant 1.000000e+00 : f32
    %7 = arith.subf %cst, %0 : f32
    %8 = vector.broadcast %7 : f32 to vector<4x256xf32>
    %9 = arith.mulf %4, %8 : vector<4x256xf32>
    %10 = arith.addf %6, %9 : vector<4x256xf32>
    %c0_6 = arith.constant 0 : index
    %c0_7 = arith.constant 0 : index
    %c0_8 = arith.constant 0 : index
    %11 = vector.load %arg7[%c0_6, %c0_7, %c0_8] : memref<1x4x256xf32, #tpu.memory_space<vmem>>, vector<1x4x256xf32>
    %12 = vector.shape_cast %11 : vector<1x4x256xf32> to vector<4x256xf32>
    %13 = vector.shape_cast %10 : vector<4x256xf32> to vector<1x4x256xf32>
    tpu.vector_store %arg7[%c0_6, %c0_7, %c0_8], %13 {strides = array<i32>} : memref<1x4x256xf32, #tpu.memory_space<vmem>>, vector<1x4x256xf32>,
    return
  }
  func.func @transform_0(%arg0: i32, %arg1: i32, %arg2: memref<2xi32, #tpu.memory_space<smem>>) -> i32 {
    %c0_i32 = arith.constant 0 : i32
    %c0_i32_0 = arith.constant 0 : i32
    return %c0_i32 : i32
  }
  func.func @transform_1(%arg0: i32, %arg1: i32, %arg2: memref<2xi32, #tpu.memory_space<smem>>) -> i32 {
    %c0_i32 = arith.constant 0 : i32
    %c0_i32_0 = arith.constant 0 : i32
    return %c0_i32 : i32
  }
  func.func @transform_2(%arg0: i32, %arg1: i32, %arg2: memref<2xi32, #tpu.memory_space<smem>>) -> (i32, i32, i32) {
    %c0_i32 = arith.constant 0 : i32
    %c0_i32_0 = arith.constant 0 : i32
    return %arg0, %c0_i32, %arg1 : i32, i32, i32
  }
  func.func @transform_3(%arg0: i32, %arg1: i32, %arg2: memref<2xi32, #tpu.memory_space<smem>>) -> (i32, i32, i32) {
    %0 = arith.index_cast %arg0 : i32 to index
    %1 = memref.load %arg2[%0] : memref<2xi32, #tpu.memory_space<smem>>
    %c0_i32 = arith.constant 0 : i32
    %c0_i32_0 = arith.constant 0 : i32
    return %1, %c0_i32, %arg1 : i32, i32, i32
  }
  func.func @transform_4(%arg0: i32, %arg1: i32, %arg2: memref<2xi32, #tpu.memory_space<smem>>) -> (i32, i32, i32) {
    %c0_i32 = arith.constant 0 : i32
    %c0_i32_0 = arith.constant 0 : i32
    return %arg0, %c0_i32, %arg1 : i32, i32, i32
  }
}

</mosaic_0001>

<bundles_post_ra>
// kernel: mixup_blend_pallas.1
= control target key start
LH: loop header
LB: loop body
LE: loop exit
PB: predicated region body
PF: predicated region fallthrough
CT: control target
= control target key end

     0   :  { %s641_s0 = inlined_call_operand.vmem [shape: s32[2], index: 0, kind: input, shape index: {}]   ;;  %s642_s1 = inlined_call_operand.vmem [shape: s32[4], index: 1, kind: input, shape index: {}]   ;;  %s643_s2 = inlined_call_operand.<no memory space> [shape: f32[1], index: 2, kind: input, shape index: {}]   ;;  %s644_s3 = inlined_call_operand.vmem [shape: f32[2,4,256], index: 3, kind: input, shape index: {}, may-alias: {3,4}]   ;;  %s645_s4 = inlined_call_operand.vmem [shape: f32[2,4,256], index: 4, kind: input, shape index: {}, may-alias: {3,4}]   ;;  %s646_s5 = inlined_call_operand.vmem [shape: f32[2,4,256], index: 5, kind: output, shape index: {}]  }
   0x1   :  { %s10_s20 = sshll.u32 %s641_s0, 4  ;;  %14 = sst [smem:[#allocation4]] %s643_s2  ;;  %s11_s20 = int_to_ptr.vmem [resolvable:$true] %s10_s20 }
   0x2   :  { %s483_s23 = scalar_lea.vmem %s11_s20, 16  ;;  %p488_p1 = scmp.lt.s32.totalorder %s11_s20, %s11_s20 }
   0x3   :  { %p484_p0 = scmp.ne.s32.totalorder %s11_s20, %s483_s23  ;;  %p489_p2 = scmp.lt.s32.totalorder %s483_s23, %s483_s23 }
   0x5   :  { %p490_p3 = por %p489_p2, %p488_p1 }
   0x7   :  { %p491_p4 = pnand %p490_p3, %p484_p0 }
   0x9   :  { %494 = shalt.err (!%p491_p4)  }
   0xa   :  { %s540_s24 = smov [#allocation3]  }
   0xb   :  { %13 = dma.vmem_to_smem %s11_s20, 16, %s540_s24, [#allocation2] }
   0xc   :  { %522 = dma.done.wait [#allocation2], 16 }
   0xd   :  { %523 = vsyncadd [#allocation2], 4294967280 }
   0xe   :  { %16 = sfence }
   0xf   :  { %17 = vsyncpa [#allocation6], 0  ;;  %s578_s25 = smov 0   ;;  %s580_s0 = smov 0  }
  0x10   :  { %s582_s26 = smov 0  }
  0x11 LB: > { %s429_s2 = sadd.s32 4294967295, %s538_s26   ;;  %s35_s27 = sadd.s32 1, %s534_s0  ;;  %s538_s26 = sphi %s582_s26, %s23_s26   ;;  %s534_s0 = sphi %s580_s0, %s650_s0   ;;  %s530_s25 = sphi %s578_s25, %s649_s25  }
  0x12   : > { %p37_p5 = scmp.ge.s32.totalorder %s35_s27, 2  ;;  %p431_p6 = scmp.ge.s32.totalorder %s538_s26, 1 }
  0x13   : > { %p168_p7 = scmp.lt.s32.totalorder %s538_s26, 3  ;;  %p603_p9 = scmp.eq.s32.totalorder %s429_s2, 0 }
  0x14   : > { %s652_s27 = smov (%p37_p5, %s35_s27), 0  ;;  %s181_s7 = sshll.u32 %s642_s1, 4  ;;  %s182_s7 = int_to_ptr.vmem [resolvable:$true] %s181_s7 }
  0x15   : > { %p599_p8 = pnand %p431_p6, %p168_p7  ;;  %s495_s8 = scalar_lea.vmem %s182_s7, 16 }
  0x16   : > { %p496_p12 = scmp.ne.s32.totalorder %s182_s7, %s495_s8  ;;  %p503_p2 = scmp.lt.s32.totalorder %s182_s7, %s182_s7 }
  0x17   : > { %p451_p10 = pneg %p599_p8  ;;  %p504_p3 = scmp.lt.s32.totalorder %s495_s8, %s495_s8 }
  0x19   : > { %p452_p11 = pnand %p603_p9, %p451_p10  ;;  %p505_p4 = por %p504_p3, %p503_p2 }
  0x1b   : > { %p497_p13 = pneg %p452_p11 }
  0x1d   : > { %p498_p0 = pnand %p497_p13, %p496_p12 }
  0x1f   : > { %p499_p1 = pneg %p498_p0 }
  0x21   : > { %p506_p5 = pnand %p505_p4, %p499_p1 }
  0x23   : > { %509 = shalt.err (!%p506_p5)
}
  0x24   : > { %s541_s9 = smov [#allocation5]   ;;  %225 = sbr.rel (%p599_p8) target bundleno = 63 (0x3f), region = 36 }
  0x25   : > { %454 = dma.vmem_to_smem (!%p452_p11), %s182_s7, 16, %s541_s9, [#allocation6]  }
  0x2b   : > { %525 = dma.done.wait (%p603_p9), [#allocation6], 16  }
  0x2c   : > { %527 = vsyncadd (%p603_p9), [#allocation6], 4294967280 }
  0x2d   : > { %231 = sfence }
  0x2e   : > { %p271_p6 = scmp.lt.s32.totalorder %s530_s25, 1  ;;  %s280_s10 = sld [smem:[#allocation3 + %s530_s25]] }
  0x2f   : > { %s302_s11 = sld [smem:[#allocation4]] }
  0x30   : > { %s654_s25 = smov (!%p271_p6, %s530_s25), 1 }
  0x31   : > { %s444_s12 = sshll.u32 %s654_s25, 3 }
  0x32   : > { %s278_s15 = scalar_lea.vmem %s644_s3, %s444_s12  ;;  %s300_s23 = scalar_lea.vmem %s646_s5, %s444_s12 }
  0x33   : > { %v303_v0 = vld [vmem:[%s278_s15] sm:$0xff] }
  0x34   : > { %p282_p7 = scmp.lt.s32.totalorder %s280_s10, 1 }
  0x35   : > { %s307_s16 = ssub.f32 1.0, %s302_s11  ;;  %v305_v1 = vstv %s302_s11 }
  0x36   : > { %s656_s10 = smov (!%p282_p7, %s280_s10), 1  ;;  %v306_v3 = vmul.f32 %v305_v1, %v303_v0 }
  0x37   : > { %s445_s17 = sshll.u32 %s656_s10, 3  ;;  %v308_v2 = vstv %s307_s16 }
  0x38   : > { %s289_s20 = scalar_lea.vmem %s645_s4, %s445_s17 }
  0x39   : > { %v304_v4 = vld [vmem:[%s289_s20] sm:$0xff] }
  0x3a   : > { %v309_v5 = vmul.f32 %v308_v2, %v304_v4 }
  0x3c   : > { %v310_v6 = vadd.f32 %v309_v5, %v306_v3 }
  0x3e   : > { %311 = vst [vmem:[%s300_s23] sm:$0xff] %v310_v6 }
  0x3f PF: > { %s23_s26 = sadd.s32 1, %s538_s26   ;;  %s649_s25 = smov %s534_s0 }
  0x40   : > { %p20_p8 = scmp.ge.s32.totalorder %s23_s26, 4   ;;  %s650_s0 = smov %s652_s27 }
  0x42   :  { %22 = sbr.rel (!%p20_p8) target bundleno = 17 (0x11), region = 74 }
  0x49   :  { %342 = vsyncpa [#allocation6], 1 }
  0x4a   :  { %344 = vsyncpa [#allocation6 + $0x1], 1 }

</bundles_post_ra>
